<compile_context>
chip_gen: v7x
topology: tpu7x:2x2x1
jax: 0.10.0
libtpu: 0.0.40
codegen_flags: <defaults>
</compile_context>

<pallas_src>
from math import sqrt

import jax
import jax.numpy as jnp
from jax.experimental import pallas as pl
from jax.experimental.pallas import tpu as pltpu


def _round_up(x, m):
    return ((x + m - 1) // m) * m


def _pick_blocking(batch):
    """Choose (block_b, b_pad).

    * block_b is a multiple of 8 (sublane tiling of the streamed x block);
      with multiple grid steps it is a multiple of 128 so the lane-dense
      output block is stored with unmasked vst.
    * minimizes padded (wasted) rows, prefers >=2 grid steps (v7x dual-TC),
      then larger blocks (amortize per-step overhead), capped at 512 rows.
    """
    if batch <= 128:
        bb = _round_up(max(batch, 1), 8)
        return bb, bb
    best = None
    for bb in (128, 256, 384, 512):
        b_pad = _round_up(batch, bb)
        waste = b_pad - batch
        steps = b_pad // bb
        key = (waste, 0 if steps >= 2 else 1, -bb)
        if best is None or key < best[0]:
            best = (key, bb, b_pad)
    return best[1], best[2]


# ----------------------------- Pallas kernel -------------------------------
def _fused_head_kernel(x_ref, pw_ref, pb_ref, w1_ref, b1_ref, w2_ref, b2_ref,
                       w3_ref, b3_ref, o_ref):
    """pooler(dense+tanh) -> fc1 -> relu -> fc2 -> relu -> fc3 (row reduce).

    x_ref : [TB, H]    bf16  masked-mean pooled embeddings (cast in wrapper)
    pw_ref: [H, H]     bf16   pb_ref: [1, H]   f32
    w1_ref: [H, 512]   bf16   b1_ref: [1, 512] f32
    w2_ref: [512, 256] bf16   b2_ref: [1, 256] f32
    w3_ref: [1, 256]   f32    (fc3 weight as a row -> VPU lane reduction)
    b3_ref: [1, 1]     f32    (scalar, SMEM)
    o_ref : [8, TB]    f32    lane-dense tile, all 8 sublanes identical;
                              wrapper reads row 0.
    """
    x = x_ref[...]                                            # bf16, no cast

    # BERT pooler: tanh(x @ pool_w + pool_b).  f32 MXU accumulate, bf16 tanh
    # (single cast on the serial pooler->fc1 chain).
    p = jnp.dot(x, pw_ref[...], preferred_element_type=jnp.float32)
    p = jnp.tanh((p + pb_ref[...]).astype(jnp.bfloat16))

    # fc1 + ReLU (f32 epilogue, one bf16 cast feeding the next MXU op)
    h1 = jnp.dot(p, w1_ref[...], preferred_element_type=jnp.float32)
    h1 = jnp.maximum(h1 + b1_ref[...], 0.0).astype(jnp.bfloat16)

    # fc2 + ReLU
    h2 = jnp.dot(h1, w2_ref[...], preferred_element_type=jnp.float32)
    h2 = jnp.maximum(h2 + b2_ref[...], 0.0)

    # fc3 (out_features=1): VPU/XLU lane reduction instead of an N=1 matmul.
    y = jnp.sum(h2 * w3_ref[...], axis=-1) + b3_ref[0, 0]     # [TB]

    # Lane-dense writeback: one small [8, TB] tile per block (sublane
    # broadcast is cheap); wrapper slices row 0.
    o_ref[...] = jnp.broadcast_to(y[None, :], o_ref.shape).astype(o_ref.dtype)


def fused_head_pallas(pooled, params):
    """pooled: [B, H] f32 masked-mean embedding -> [B] f32 age prediction."""
    B, H = pooled.shape
    block_b, b_pad = _pick_blocking(B)
    n_blocks = b_pad // block_b

    # bf16 streaming input: halves the dominant per-step HBM read.
    x16 = pooled.astype(jnp.bfloat16)
    if b_pad != B:
        x16 = jnp.pad(x16, ((0, b_pad - B), (0, 0)))

    rep = lambda a: pl.BlockSpec(a.shape, lambda i: (0,) * a.ndim)

    weight_elems = H * H + H * 512 + 512 * 256
    cost = pl.CostEstimate(
        flops=2 * b_pad * (weight_elems + 256),
        transcendentals=b_pad * H,
        bytes_accessed=(b_pad * H * 2            # bf16 pooled input
                        + weight_elems * 2       # bf16 weights
                        + (2 * H + 512 + 2 * 256 + 1) * 4  # f32 biases/w3 row
                        + 8 * b_pad * 4))        # f32 output tile

    out = pl.pallas_call(
        _fused_head_kernel,
        out_shape=jax.ShapeDtypeStruct((8, b_pad), jnp.float32),
        grid=(n_blocks,),
        in_specs=[
            pl.BlockSpec((block_b, H), lambda i: (i, 0)),      # pooled x
            rep(params["pool_w"]), rep(params["pool_b"]),
            rep(params["w1"]), rep(params["b1"]),
            rep(params["w2"]), rep(params["b2"]),
            rep(params["w3_row"]),
            pl.BlockSpec(memory_space=pltpu.MemorySpace.SMEM),  # b3 scalar
        ],
        out_specs=pl.BlockSpec((8, block_b), lambda i: (0, i)),
        compiler_params=pltpu.CompilerParams(
            dimension_semantics=("parallel",)),
        cost_estimate=cost,
    )(x16, params["pool_w"], params["pool_b"],
      params["w1"], params["b1"], params["w2"], params["b2"],
      params["w3_row"], params["b3"])

    return out[0, :B]                                          # squeeze(-1)


# -------------------------- parameter construction -------------------------
def _uniform_linear(key, fan_in, fan_out):
    """PyTorch nn.Linear default init: U(-1/sqrt(in), 1/sqrt(in))."""
    kw, kb = jax.random.split(key)
    bound = 1.0 / sqrt(fan_in)
    w = jax.random.uniform(kw, (fan_in, fan_out), jnp.float32, -bound, bound)
    b = jax.random.uniform(kb, (1, fan_out), jnp.float32, -bound, bound)
    return w, b


def init_params(key, hidden_size, vocab_size):
    keys = jax.random.split(key, 5)
    params = {}
    # Stand-in for the frozen BERT encoder (deterministic, not trainable).
    # TODO(synk): the full transformers BertModel encoder has no clean
    # single-kernel Pallas equivalent here; pooler_output is modeled as
    # embedding lookup -> masked mean -> dense -> tanh, with the dense+tanh
    # fused into the Pallas head kernel.
    params["embed"] = 0.02 * jax.random.normal(
        keys[0], (vocab_size, hidden_size), jnp.float32)
    pw, pb = _uniform_linear(keys[1], hidden_size, hidden_size)
    w1, b1 = _uniform_linear(keys[2], hidden_size, 512)
    w2, b2 = _uniform_linear(keys[3], 512, 256)
    w3, b3 = _uniform_linear(keys[4], 256, 1)
    # bf16 for the big matmul weights (halves weight DMA, MXU-native);
    # biases / fc3 row / accumulation stay f32.
    params["pool_w"] = pw.astype(jnp.bfloat16)
    params["pool_b"] = pb
    params["w1"] = w1.astype(jnp.bfloat16)
    params["b1"] = b1
    params["w2"] = w2.astype(jnp.bfloat16)
    params["b2"] = b2
    params["w3_row"] = w3.T                       # [1, 256] f32
    params["b3"] = b3.reshape(1, 1)               # [1, 1]   f32 (SMEM scalar)
    return params


# ------------------------------ forward pass --------------------------------
def masked_mean_embed(params, input_ids, attention_mask):
    """Plain-JAX glue producing the [B, H] pooled embedding fed to the kernel."""
    emb = params["embed"][input_ids]                       # [B, S, H]
    mask = attention_mask.astype(jnp.float32)[..., None]   # [B, S, 1]
    summed = jnp.sum(emb * mask, axis=1)
    count = jnp.maximum(jnp.sum(mask, axis=1), 1.0)
    return summed / count                                  # [B, H]


@jax.jit
def age_prediction_forward(params, input_ids, attention_mask):
    pooled = masked_mean_embed(params, input_ids, attention_mask)  # [B, H]
    return fused_head_pallas(pooled, params)                       # [B]


# --------------------------------- main -------------------------------------
if __name__ == "__main__":
    B, S, H, VOCAB = 8, 16, 128, 1000   # small shapes; H = bert hidden_size

    key = jax.random.PRNGKey(0)
    k_params, k_ids, k_len = jax.random.split(key, 3)

    params = init_params(k_params, H, VOCAB)

    input_ids = jax.random.randint(k_ids, (B, S), 0, VOCAB, dtype=jnp.int32)
    lengths = jax.random.randint(k_len, (B,), 4, S + 1, dtype=jnp.int32)
    attention_mask = (jnp.arange(S)[None, :] < lengths[:, None]).astype(jnp.int32)

    age_pred = age_prediction_forward(params, input_ids, attention_mask)
    age_pred = jax.block_until_ready(age_pred)

    # Reference: plain JAX mirroring the kernel's dtype choices exactly.
    pooled = masked_mean_embed(params, input_ids, attention_mask)
    x16 = pooled.astype(jnp.bfloat16)
    p = jnp.tanh((jnp.dot(x16, params["pool_w"],
                          preferred_element_type=jnp.float32)
                  + params["pool_b"]).astype(jnp.bfloat16))
    h1 = jnp.maximum(jnp.dot(p, params["w1"],
                             preferred_element_type=jnp.float32)
                     + params["b1"], 0.0).astype(jnp.bfloat16)
    h2 = jnp.maximum(jnp.dot(h1, params["w2"],
                             preferred_element_type=jnp.float32)
                     + params["b2"], 0.0)
    ref = jnp.sum(h2 * params["w3_row"], axis=-1) + params["b3"][0, 0]

    assert age_pred.shape == (B,)
    max_err = float(jnp.max(jnp.abs(age_pred - ref)))
    assert jnp.allclose(age_pred, ref, atol=1e-2, rtol=1e-2), max_err

    print("KERNEL_OK")
</pallas_src>

<mosaic_0001>
module attributes {stable_mosaic.version = 11 : i64} {
  func.func @_fused_head_kernel(%arg0: i32, %arg1: memref<8x128xbf16, #tpu.memory_space<vmem>>, %arg2: memref<128x128xbf16, #tpu.memory_space<vmem>>, %arg3: memref<1x128xf32, #tpu.memory_space<vmem>>, %arg4: memref<128x512xbf16, #tpu.memory_space<vmem>>, %arg5: memref<1x512xf32, #tpu.memory_space<vmem>>, %arg6: memref<512x256xbf16, #tpu.memory_space<vmem>>, %arg7: memref<1x256xf32, #tpu.memory_space<vmem>>, %arg8: memref<1x256xf32, #tpu.memory_space<vmem>>, %arg9: memref<1x1xf32, #tpu.memory_space<smem>>, %arg10: memref<8x8xf32, #tpu.memory_space<vmem>>) attributes {dimension_semantics = [#tpu.dimension_semantics<parallel>], iteration_bounds = array<i64: 1>, scalar_prefetch = 0 : i64, scratch_operands = 0 : i64, tpu.core_type = #tpu.core_type<tc>, window_params = [{transform_indices = @transform_0, window_bounds = array<i64: 8, 128>}, {pipeline_mode = #tpu.pipeline_mode<synchronous>, transform_indices = @transform_1, window_bounds = array<i64: 128, 128>}, {pipeline_mode = #tpu.pipeline_mode<synchronous>, transform_indices = @transform_2, window_bounds = array<i64: 1, 128>}, {pipeline_mode = #tpu.pipeline_mode<synchronous>, transform_indices = @transform_3, window_bounds = array<i64: 128, 512>}, {pipeline_mode = #tpu.pipeline_mode<synchronous>, transform_indices = @transform_4, window_bounds = array<i64: 1, 512>}, {pipeline_mode = #tpu.pipeline_mode<synchronous>, transform_indices = @transform_5, window_bounds = array<i64: 512, 256>}, {pipeline_mode = #tpu.pipeline_mode<synchronous>, transform_indices = @transform_6, window_bounds = array<i64: 1, 256>}, {pipeline_mode = #tpu.pipeline_mode<synchronous>, transform_indices = @transform_7, window_bounds = array<i64: 1, 256>}, {transform_indices = @transform_8, window_bounds = array<i64: 1, 1>}, {transform_indices = @transform_9, window_bounds = array<i64: 8, 8>}]} {
    %c0 = arith.constant 0 : index
    %c0_0 = arith.constant 0 : index
    %0 = vector.load %arg1[%c0, %c0_0] : memref<8x128xbf16, #tpu.memory_space<vmem>>, vector<8x128xbf16>
    %c0_1 = arith.constant 0 : index
    %c0_2 = arith.constant 0 : index
    %1 = vector.load %arg2[%c0_1, %c0_2] : memref<128x128xbf16, #tpu.memory_space<vmem>>, vector<128x128xbf16>
    %cst = arith.constant dense<0.000000e+00> : vector<8x128xf32>
    %2 = tpu.matmul %0, %1, %cst {dimension_numbers = #tpu.dot_dimension_numbers<[1], [0], [0], [1], [0, 0, 1, 1], [], []>} : vector<8x128xbf16>, vector<128x128xbf16>, vector<8x128xf32> -> vector<8x128xf32>
    %c0_3 = arith.constant 0 : index
    %c0_4 = arith.constant 0 : index
    %3 = vector.load %arg3[%c0_3, %c0_4] : memref<1x128xf32, #tpu.memory_space<vmem>>, vector<1x128xf32>
    %4 = vector.broadcast %3 : vector<1x128xf32> to vector<8x128xf32>
    %5 = arith.addf %2, %4 : vector<8x128xf32>
    %6 = arith.truncf %5 : vector<8x128xf32> to vector<8x128xbf16>
    %7 = math.tanh %6 : vector<8x128xbf16>
    %c0_5 = arith.constant 0 : index
    %c0_6 = arith.constant 0 : index
    %8 = vector.load %arg4[%c0_5, %c0_6] : memref<128x512xbf16, #tpu.memory_space<vmem>>, vector<128x512xbf16>
    %cst_7 = arith.constant dense<0.000000e+00> : vector<8x512xf32>
    %9 = tpu.matmul %7, %8, %cst_7 {dimension_numbers = #tpu.dot_dimension_numbers<[1], [0], [0], [1], [0, 0, 1, 1], [], []>} : vector<8x128xbf16>, vector<128x512xbf16>, vector<8x512xf32> -> vector<8x512xf32>
    %c0_8 = arith.constant 0 : index
    %c0_9 = arith.constant 0 : index
    %10 = vector.load %arg5[%c0_8, %c0_9] : memref<1x512xf32, #tpu.memory_space<vmem>>, vector<1x512xf32>
    %11 = vector.broadcast %10 : vector<1x512xf32> to vector<8x512xf32>
    %12 = arith.addf %9, %11 : vector<8x512xf32>
    %cst_10 = arith.constant 0.000000e+00 : f32
    %13 = vector.broadcast %cst_10 : f32 to vector<8x512xf32>
    %14 = arith.maximumf %12, %13 : vector<8x512xf32>
    %15 = arith.truncf %14 : vector<8x512xf32> to vector<8x512xbf16>
    %c0_11 = arith.constant 0 : index
    %c0_12 = arith.constant 0 : index
    %16 = vector.load %arg6[%c0_11, %c0_12] : memref<512x256xbf16, #tpu.memory_space<vmem>>, vector<512x256xbf16>
    %cst_13 = arith.constant dense<0.000000e+00> : vector<8x256xf32>
    %17 = tpu.matmul %15, %16, %cst_13 {dimension_numbers = #tpu.dot_dimension_numbers<[1], [0], [0], [1], [0, 0, 1, 1], [], []>} : vector<8x512xbf16>, vector<512x256xbf16>, vector<8x256xf32> -> vector<8x256xf32>
    %c0_14 = arith.constant 0 : index
    %c0_15 = arith.constant 0 : index
    %18 = vector.load %arg7[%c0_14, %c0_15] : memref<1x256xf32, #tpu.memory_space<vmem>>, vector<1x256xf32>
    %19 = vector.broadcast %18 : vector<1x256xf32> to vector<8x256xf32>
    %20 = arith.addf %17, %19 : vector<8x256xf32>
    %cst_16 = arith.constant 0.000000e+00 : f32
    %21 = vector.broadcast %cst_16 : f32 to vector<8x256xf32>
    %22 = arith.maximumf %20, %21 : vector<8x256xf32>
    %c0_17 = arith.constant 0 : index
    %c0_18 = arith.constant 0 : index
    %23 = vector.load %arg8[%c0_17, %c0_18] : memref<1x256xf32, #tpu.memory_space<vmem>>, vector<1x256xf32>
    %24 = vector.broadcast %23 : vector<1x256xf32> to vector<8x256xf32>
    %25 = arith.mulf %22, %24 : vector<8x256xf32>
    %cst_19 = arith.constant dense<0.000000e+00> : vector<8xf32>
    %26 = vector.multi_reduction <add>, %25, %cst_19 [1] : vector<8x256xf32> to vector<8xf32>
    %c0_20 = arith.constant 0 : index
    %c0_21 = arith.constant 0 : index
    %27 = memref.load %arg9[%c0_20, %c0_21] : memref<1x1xf32, #tpu.memory_space<smem>>
    %28 = vector.broadcast %27 : f32 to vector<8xf32>
    %29 = arith.addf %26, %28 : vector<8xf32>
    %30 = vector.shape_cast %29 : vector<8xf32> to vector<1x8xf32>
    %31 = vector.shape_cast %30 : vector<1x8xf32> to vector<1x8xf32>
    %32 = vector.broadcast %31 : vector<1x8xf32> to vector<8x8xf32>
    %c0_22 = arith.constant 0 : index
    %c0_23 = arith.constant 0 : index
    %33 = vector.load %arg10[%c0_22, %c0_23] : memref<8x8xf32, #tpu.memory_space<vmem>>, vector<8x8xf32>
    tpu.vector_store %arg10[%c0_22, %c0_23], %32 {strides = array<i32>} : memref<8x8xf32, #tpu.memory_space<vmem>>, vector<8x8xf32>,
    return
  }
  func.func @transform_0(%arg0: i32) -> (i32, i32) {
    %c0_i32 = arith.constant 0 : i32
    %c0_i32_0 = arith.constant 0 : i32
    return %arg0, %c0_i32 : i32, i32
  }
  func.func @transform_1(%arg0: i32) -> (i32, i32) {
    %c0_i32 = arith.constant 0 : i32
    %c0_i32_0 = arith.constant 0 : i32
    %c0_i32_1 = arith.constant 0 : i32
    return %c0_i32, %c0_i32_0 : i32, i32
  }
  func.func @transform_2(%arg0: i32) -> (i32, i32) {
    %c0_i32 = arith.constant 0 : i32
    %c0_i32_0 = arith.constant 0 : i32
    %c0_i32_1 = arith.constant 0 : i32
    return %c0_i32, %c0_i32_0 : i32, i32
  }
  func.func @transform_3(%arg0: i32) -> (i32, i32) {
    %c0_i32 = arith.constant 0 : i32
    %c0_i32_0 = arith.constant 0 : i32
    %c0_i32_1 = arith.constant 0 : i32
    return %c0_i32, %c0_i32_0 : i32, i32
  }
  func.func @transform_4(%arg0: i32) -> (i32, i32) {
    %c0_i32 = arith.constant 0 : i32
    %c0_i32_0 = arith.constant 0 : i32
    %c0_i32_1 = arith.constant 0 : i32
    return %c0_i32, %c0_i32_0 : i32, i32
  }
  func.func @transform_5(%arg0: i32) -> (i32, i32) {
    %c0_i32 = arith.constant 0 : i32
    %c0_i32_0 = arith.constant 0 : i32
    %c0_i32_1 = arith.constant 0 : i32
    return %c0_i32, %c0_i32_0 : i32, i32
  }
  func.func @transform_6(%arg0: i32) -> (i32, i32) {
    %c0_i32 = arith.constant 0 : i32
    %c0_i32_0 = arith.constant 0 : i32
    %c0_i32_1 = arith.constant 0 : i32
    return %c0_i32, %c0_i32_0 : i32, i32
  }
  func.func @transform_7(%arg0: i32) -> (i32, i32) {
    %c0_i32 = arith.constant 0 : i32
    %c0_i32_0 = arith.constant 0 : i32
    %c0_i32_1 = arith.constant 0 : i32
    return %c0_i32, %c0_i32_0 : i32, i32
  }
  func.func @transform_8(%arg0: i32) -> (i32, i32) {
    %c0_i32 = arith.constant 0 : i32
    %c0_i32_0 = arith.constant 0 : i32
    %c0_i32_1 = arith.constant 0 : i32
    return %c0_i32, %c0_i32_0 : i32, i32
  }
  func.func @transform_9(%arg0: i32) -> (i32, i32) {
    %c0_i32 = arith.constant 0 : i32
    %c0_i32_0 = arith.constant 0 : i32
    return %c0_i32, %arg0 : i32, i32
  }
}

</mosaic_0001>

<bundles_post_ra>
// kernel: age_prediction_forward.1
= control target key start
LH: loop header
LB: loop body
LE: loop exit
PB: predicated region body
PF: predicated region fallthrough
CT: control target
= control target key end

     0   :  { %v1275_v0 = vmov 0.0   ;;  %vm1276_vm0 = vmmov 0   ;;  %v1277_v25 = vmov 0   ;;  %vm972_vm1 = vcmask 64512   ;;  %s1688_s1 = inlined_call_operand.vmem [shape: bf16[128,128], index: 1, kind: input, shape index: {}]   ;;  %s1689_s3 = inlined_call_operand.vmem [shape: bf16[128,512], index: 3, kind: input, shape index: {}]   ;;  %s1690_s0 = inlined_call_operand.vmem [shape: bf16[8,128], index: 0, kind: input, shape index: {}]   ;;  %s1691_s5 = inlined_call_operand.vmem [shape: bf16[512,256], index: 5, kind: input, shape index: {}]   ;;  %s1692_s2 = inlined_call_operand.vmem [shape: f32[1,128], index: 2, kind: input, shape index: {}]   ;;  %s1693_s4 = inlined_call_operand.vmem [shape: f32[1,512], index: 4, kind: input, shape index: {}]   ;;  %s1694_s6 = inlined_call_operand.vmem [shape: f32[1,256], index: 6, kind: input, shape index: {}]   ;;  %s1695_s7 = inlined_call_operand.vmem [shape: f32[1,256], index: 7, kind: input, shape index: {}]   ;;  %s1696_s8 = inlined_call_operand.<no memory space> [shape: f32[1,1], index: 8, kind: input, shape index: {}]   ;;  %s1697_s9 = inlined_call_operand.vmem [shape: f32[8,8], index: 9, kind: output, shape index: {}]  }
   0x1   :  { %1092 = vmatprep.subr.bf16.mxu0 %v1275_v0  ;;  %v1121_v1 = vld [vmem:[%s1688_s1] sm:$0xff]   ;;  %1108 = vmatprep.mubr.msk.bf16.mxu0 %vm1276_vm0, %v1275_v0  ;;  %v1122_v2 = vld [vmem:[%s1688_s1 + $0x8] sm:$0xff]   ;;  %v1123_v3 = vld [vmem:[%s1688_s1 + $0x10] sm:$0xff]  }
   0x2   :  { %1093 = vmatpush3.bf16.msra.mxu0 %v1121_v1  ;;  %v1124_v4 = vld [vmem:[%s1688_s1 + $0x18] sm:$0xff]   ;;  %v1125_v5 = vld [vmem:[%s1688_s1 + $0x20] sm:$0xff]   ;;  %v1126_v6 = vld [vmem:[%s1688_s1 + $0x28] sm:$0xff]  }
   0x3   :  { %1094 = vmatprep.subr.bf16.mxu0 %v1275_v0  ;;  %v1127_v7 = vld [vmem:[%s1688_s1 + $0x30] sm:$0xff]   ;;  %v1128_v8 = vld [vmem:[%s1688_s1 + $0x38] sm:$0xff]   ;;  %v34_v10 = vld [vmem:[%s1690_s0] sm:$0xf] }
   0x4   :  { %v1131_v9 = vld [vmem:[%s1689_s3 + $0x4] ss:$16 sps:$4 sm:$0xff]   ;;  %v1129_v11 = vld [vmem:[%s1689_s3] ss:$16 sps:$4 sm:$0xff]   ;;  %v1155_v27 = vld [vmem:[%s1689_s3 + $0xc] ss:$16 sps:$4 sm:$0xff]  }
   0x5   :  { %v1134_v12 = vld [vmem:[%s1689_s3 + $0x24] ss:$16 sps:$4 sm:$0xff]   ;;  %v1132_v13 = vld [vmem:[%s1689_s3 + $0x20] ss:$16 sps:$4 sm:$0xff]   ;;  %v1153_v63 = vld [vmem:[%s1689_s3 + $0x8] ss:$16 sps:$4 sm:$0xff]  }
   0x6   :  { %1095 = vmatpush3.bf16.msra.mxu0 %v1122_v2  ;;  %v1137_v14 = vld [vmem:[%s1689_s3 + $0x44] ss:$16 sps:$4 sm:$0xff]   ;;  %v1135_v15 = vld [vmem:[%s1689_s3 + $0x40] ss:$16 sps:$4 sm:$0xff]   ;;  %v1156_v2 = vld [vmem:[%s1689_s3 + $0x28] ss:$16 sps:$4 sm:$0xff]  }
   0x7   :  { %1096 = vmatprep.subr.bf16.mxu0 %v1275_v0  ;;  %v1140_v16 = vld [vmem:[%s1689_s3 + $0x64] ss:$16 sps:$4 sm:$0xff]   ;;  %v1138_v17 = vld [vmem:[%s1689_s3 + $0x60] ss:$16 sps:$4 sm:$0xff]  }
   0x8   :  { %v1143_v18 = vld [vmem:[%s1689_s3 + $0x84] ss:$16 sps:$4 sm:$0xff]   ;;  %v1141_v19 = vld [vmem:[%s1689_s3 + $0x80] ss:$16 sps:$4 sm:$0xff]  }
   0x9   :  { %v1146_v20 = vld [vmem:[%s1689_s3 + $0xa4] ss:$16 sps:$4 sm:$0xff]   ;;  %v1144_v21 = vld [vmem:[%s1689_s3 + $0xa0] ss:$16 sps:$4 sm:$0xff]  }
   0xa   :  { %1097 = vmatpush3.bf16.msra.mxu0 %v1123_v3  ;;  %v1147_v22 = vld [vmem:[%s1689_s3 + $0xc0] ss:$16 sps:$4 sm:$0xff]   ;;  %v1149_v23 = vld [vmem:[%s1689_s3 + $0xc4] ss:$16 sps:$4 sm:$0xff]   ;;  %v1161_v3 = vld [vmem:[%s1689_s3 + $0x4c] ss:$16 sps:$4 sm:$0xff]  }
   0xb   :  { %1098 = vmatprep.subr.bf16.mxu0 %v1275_v0  ;;  %v1152_v24 = vld [vmem:[%s1689_s3 + $0xe4] ss:$16 sps:$4 sm:$0xff]   ;;  %v1150_v26 = vld [vmem:[%s1689_s3 + $0xe0] ss:$16 sps:$4 sm:$0xff]  }
   0xc   :  { %v1177_v28 = vld [vmem:[%s1691_s5 + $0x4] ss:$8 sps:$4 sm:$0xff]   ;;  %v1179_v29 = vld [vmem:[%s1691_s5] ss:$8 sps:$4 sm:$0xff]   ;;  %v1180_v30 = vld [vmem:[%s1691_s5 + $0x14] ss:$8 sps:$4 sm:$0xff]  }
   0xd   :  { %848 = vmatprep.subr.bf16.mxu1 %v1177_v28  ;;  %v1182_v31 = vld [vmem:[%s1691_s5 + $0x10] ss:$8 sps:$4 sm:$0xff]   ;;  %v1183_v32 = vld [vmem:[%s1691_s5 + $0x24] ss:$8 sps:$4 sm:$0xff]   ;;  %v1185_v33 = vld [vmem:[%s1691_s5 + $0x20] ss:$8 sps:$4 sm:$0xff]  }
   0xe   :  { %1099 = vmatpush3.bf16.msra.mxu0 %v1124_v4  ;;  %849 = vmatpush1.bf16.msra.mxu1 %v1179_v29  ;;  %v1186_v34 = vld [vmem:[%s1691_s5 + $0x34] ss:$8 sps:$4 sm:$0xff]   ;;  %v1188_v35 = vld [vmem:[%s1691_s5 + $0x30] ss:$8 sps:$4 sm:$0xff]   ;;  %v1189_v36 = vld [vmem:[%s1691_s5 + $0x44] ss:$8 sps:$4 sm:$0xff]  }
   0xf   :  { %1100 = vmatprep.subr.bf16.mxu0 %v1275_v0  ;;  %850 = vmatprep.subr.bf16.mxu1 %v1180_v30  ;;  %v1191_v37 = vld [vmem:[%s1691_s5 + $0x40] ss:$8 sps:$4 sm:$0xff]   ;;  %v1192_v38 = vld [vmem:[%s1691_s5 + $0x54] ss:$8 sps:$4 sm:$0xff]   ;;  %v1194_v39 = vld [vmem:[%s1691_s5 + $0x50] ss:$8 sps:$4 sm:$0xff]  }
  0x10   :  { %v1195_v40 = vld [vmem:[%s1691_s5 + $0x64] ss:$8 sps:$4 sm:$0xff]   ;;  %v1197_v41 = vld [vmem:[%s1691_s5 + $0x60] ss:$8 sps:$4 sm:$0xff]   ;;  %v1198_v42 = vld [vmem:[%s1691_s5 + $0x74] ss:$8 sps:$4 sm:$0xff]  }
  0x11   :  { %v1200_v43 = vld [vmem:[%s1691_s5 + $0x70] ss:$8 sps:$4 sm:$0xff]   ;;  %v1201_v44 = vld [vmem:[%s1691_s5 + $0x84] ss:$8 sps:$4 sm:$0xff]   ;;  %v1203_v45 = vld [vmem:[%s1691_s5 + $0x80] ss:$8 sps:$4 sm:$0xff]  }
  0x12   :  { %1101 = vmatpush3.bf16.msra.mxu0 %v1125_v5  ;;  %851 = vmatpush1.bf16.msra.mxu1 %v1182_v31  ;;  %v1204_v46 = vld [vmem:[%s1691_s5 + $0x94] ss:$8 sps:$4 sm:$0xff]   ;;  %v1206_v47 = vld [vmem:[%s1691_s5 + $0x90] ss:$8 sps:$4 sm:$0xff]   ;;  %v1207_v48 = vld [vmem:[%s1691_s5 + $0xa4] ss:$8 sps:$4 sm:$0xff]  }
  0x13   :  { %1102 = vmatprep.subr.bf16.mxu0 %v1275_v0  ;;  %852 = vmatprep.subr.bf16.mxu1 %v1183_v32  ;;  %v1209_v49 = vld [vmem:[%s1691_s5 + $0xa0] ss:$8 sps:$4 sm:$0xff]   ;;  %v1210_v50 = vld [vmem:[%s1691_s5 + $0xb4] ss:$8 sps:$4 sm:$0xff]   ;;  %v1212_v51 = vld [vmem:[%s1691_s5 + $0xb0] ss:$8 sps:$4 sm:$0xff]  }
  0x14   :  { %v1213_v52 = vld [vmem:[%s1691_s5 + $0xc4] ss:$8 sps:$4 sm:$0xff]   ;;  %v1215_v53 = vld [vmem:[%s1691_s5 + $0xc0] ss:$8 sps:$4 sm:$0xff]   ;;  %v1216_v54 = vld [vmem:[%s1691_s5 + $0xd4] ss:$8 sps:$4 sm:$0xff]  }
  0x15   :  { %v1218_v55 = vld [vmem:[%s1691_s5 + $0xd0] ss:$8 sps:$4 sm:$0xff]   ;;  %v978_v56 = vld [vmem:[%s1692_s2] ss:$0 sm:$0xff]  ;;  %v1164_v5 = vld [vmem:[%s1689_s3 + $0x6c] ss:$16 sps:$4 sm:$0xff]  }
  0x16   :  { %1103 = vmatpush3.bf16.msra.mxu0 %v1126_v6  ;;  %853 = vmatpush1.bf16.msra.mxu1 %v1185_v33  ;;  %v1159_v4 = vld [vmem:[%s1689_s3 + $0x48] ss:$16 sps:$4 sm:$0xff]  }
  0x17   :  { %1104 = vmatprep.subr.bf16.mxu0 %v1275_v0  ;;  %854 = vmatprep.subr.bf16.mxu1 %v1186_v34  ;;  %v1162_v6 = vld [vmem:[%s1689_s3 + $0x68] ss:$16 sps:$4 sm:$0xff]  }
  0x1a   :  { %1105 = vmatpush3.bf16.msra.mxu0 %v1127_v7  ;;  %855 = vmatpush1.bf16.msra.mxu1 %v1188_v35  ;;  %v1167_v7 = vld [vmem:[%s1689_s3 + $0x8c] ss:$16 sps:$4 sm:$0xff]  }
  0x1b   :  { %1106 = vmatprep.subr.bf16.mxu0 %v1275_v0  ;;  %856 = vmatprep.subr.bf16.mxu1 %v1189_v36  ;;  %v1158_v0 = vld [vmem:[%s1689_s3 + $0x2c] ss:$16 sps:$4 sm:$0xff]   ;;  %v1225_v36 = vld [vmem:[%s1691_s5 + $0x100] ss:$8 sps:$4 sm:$0xff]  }
  0x1e   :  { %1107 = vmatpush3.bf16.msra.mxu0 %v1128_v8  ;;  %857 = vmatpush1.bf16.msra.mxu1 %v1191_v37  ;;  %v1165_v8 = vld [vmem:[%s1689_s3 + $0x88] ss:$16 sps:$4 sm:$0xff]  }
  0x1f   :  { %362 = vmatprep.subr.bf16.mxu0 %v1131_v9  ;;  %858 = vmatprep.subr.bf16.mxu1 %v1192_v38  ;;  %v1170_v9 = vld [vmem:[%s1689_s3 + $0xac] ss:$16 sps:$4 sm:$0xff]  }
  0x20   :  { %v1230_v38 = vld [vmem:[%s1691_s5 + $0x114] ss:$8 sps:$4 sm:$0xff]  }
  0x21   :  { %1109 = vmatmul.mubr.bf16.vlgmr.msra.gmra.mrb[0].mxu0 %v34_v10  ;;  %v1168_v10 = vld [vmem:[%s1689_s3 + $0xa8] ss:$16 sps:$4 sm:$0xff]  }
  0x22   :  { %363 = vmatpush1.bf16.msra.mxu0 %v1129_v11  ;;  %394 = vmatprep.mubr.bf16.mxu0 %v1277_v25  ;;  %v1173_v11 = vld [vmem:[%s1689_s3 + $0xcc] ss:$16 sps:$4 sm:$0xff]  }
  0x23   :  { %364 = vmatprep.subr.bf16.mxu0 %v1134_v12  ;;  %859 = vmatpush1.bf16.msra.mxu1 %v1194_v39  ;;  %v1171_v12 = vld [vmem:[%s1689_s3 + $0xc8] ss:$16 sps:$4 sm:$0xff]  }
  0x24   :  { %860 = vmatprep.subr.bf16.mxu1 %v1195_v40  ;;  %v1228_v39 = vld [vmem:[%s1691_s5 + $0x110] ss:$8 sps:$4 sm:$0xff]   ;;  %v1233_v40 = vld [vmem:[%s1691_s5 + $0x124] ss:$8 sps:$4 sm:$0xff]  }
  0x26   :  { %365 = vmatpush1.bf16.msra.mxu0 %v1132_v13  ;;  %v1176_v13 = vld [vmem:[%s1689_s3 + $0xec] ss:$16 sps:$4 sm:$0xff]  }
  0x27   :  { %366 = vmatprep.subr.bf16.mxu0 %v1137_v14  ;;  %861 = vmatpush1.bf16.msra.mxu1 %v1197_v41  ;;  %v1174_v14 = vld [vmem:[%s1689_s3 + $0xe8] ss:$16 sps:$4 sm:$0xff]  }
  0x28   :  { %862 = vmatprep.subr.bf16.mxu1 %v1198_v42  ;;  %v1231_v41 = vld [vmem:[%s1691_s5 + $0x120] ss:$8 sps:$4 sm:$0xff]   ;;  %v1236_v42 = vld [vmem:[%s1691_s5 + $0x134] ss:$8 sps:$4 sm:$0xff]  }
  0x2a   :  { %367 = vmatpush1.bf16.msra.mxu0 %v1135_v15  ;;  %v1219_v15 = vld [vmem:[%s1691_s5 + $0xe4] ss:$8 sps:$4 sm:$0xff]  }
  0x2b   :  { %368 = vmatprep.subr.bf16.mxu0 %v1140_v16  ;;  %863 = vmatpush1.bf16.msra.mxu1 %v1200_v43  ;;  %v1221_v16 = vld [vmem:[%s1691_s5 + $0xe0] ss:$8 sps:$4 sm:$0xff]   ;;  %v1234_v43 = vld [vmem:[%s1691_s5 + $0x130] ss:$8 sps:$4 sm:$0xff]  }
  0x2c   :  { %864 = vmatprep.subr.bf16.mxu1 %v1201_v44  ;;  %v1239_v44 = vld [vmem:[%s1691_s5 + $0x144] ss:$8 sps:$4 sm:$0xff]  }
  0x2e   :  { %369 = vmatpush1.bf16.msra.mxu0 %v1138_v17  ;;  %v1222_v17 = vld [vmem:[%s1691_s5 + $0xf4] ss:$8 sps:$4 sm:$0xff]  }
  0x2f   :  { %370 = vmatprep.subr.bf16.mxu0 %v1143_v18  ;;  %865 = vmatpush1.bf16.msra.mxu1 %v1203_v45  ;;  %v1224_v18 = vld [vmem:[%s1691_s5 + $0xf0] ss:$8 sps:$4 sm:$0xff]   ;;  %v1237_v45 = vld [vmem:[%s1691_s5 + $0x140] ss:$8 sps:$4 sm:$0xff]  }
  0x30   :  { %866 = vmatprep.subr.bf16.mxu1 %v1204_v46  ;;  %v1242_v46 = vld [vmem:[%s1691_s5 + $0x154] ss:$8 sps:$4 sm:$0xff]  }
  0x32   :  { %371 = vmatpush1.bf16.msra.mxu0 %v1141_v19  ;;  %v1227_v19 = vld [vmem:[%s1691_s5 + $0x104] ss:$8 sps:$4 sm:$0xff]  }
  0x33   :  { %372 = vmatprep.subr.bf16.mxu0 %v1146_v20  ;;  %867 = vmatpush1.bf16.msra.mxu1 %v1206_v47  ;;  %v182_v20 = vlaneseq  ;;  %v1240_v47 = vld [vmem:[%s1691_s5 + $0x150] ss:$8 sps:$4 sm:$0xff]  }
  0x34   :  { %868 = vmatprep.subr.bf16.mxu1 %v1207_v48 }
  0x36   :  { %373 = vmatpush1.bf16.msra.mxu0 %v1144_v21  ;;  %v1556_v21 = vshrl.u32 %v182_v20, 7 }
  0x37   :  { %374 = vmatprep.subr.bf16.mxu0 %v1149_v23  ;;  %869 = vmatpush1.bf16.msra.mxu1 %v1209_v49  ;;  %v1564_v23 = vld [vmem:[%s1693_s4] sm:$0xf]  ;;  %v1245_v49 = vld [vmem:[%s1691_s5 + $0x164] ss:$8 sps:$4 sm:$0xff]  }
  0x38   :  { %870 = vmatprep.subr.bf16.mxu1 %v1210_v50  ;;  %v196_v48 = vsub.s32 3, %v1556_v21 }
  0x3a   :  { %375 = vmatpush1.bf16.msra.mxu0 %v1147_v22  ;;  %v1559_v22 = vsub.s32 0, %v1556_v21  ;;  %v197_v50 = vrot.slane %v1564_v23, %v196_v48 }
  0x3b   :  { %376 = vmatprep.subr.bf16.mxu0 %v1152_v24  ;;  %871 = vmatpush1.bf16.msra.mxu1 %v1212_v51  ;;  %v1567_v24 = vsub.s32 1, %v1556_v21  ;;  %v1243_v51 = vld [vmem:[%s1691_s5 + $0x160] ss:$8 sps:$4 sm:$0xff]  }
  0x3c   :  { %872 = vmatprep.subr.bf16.mxu1 %v1213_v52  ;;  %v1248_v52 = vld [vmem:[%s1691_s5 + $0x174] ss:$8 sps:$4 sm:$0xff]  }
  0x3e   :  { %377 = vmatpush1.bf16.msra.mxu0 %v1150_v26  ;;  %v189_v26 = vrot.slane %v1564_v23, %v1567_v24 }
  0x3f   :  { %403 = vmatprep.subr.bf16.mxu0 %v1155_v27  ;;  %873 = vmatpush1.bf16.msra.mxu1 %v1215_v53 }
  0x40   :  { %874 = vmatprep.subr.bf16.mxu1 %v1216_v54 }
  0x43   :  { %875 = vmatpush1.bf16.msra.mxu1 %v1218_v55 }
  0x44   :  { %876 = vmatprep.subr.bf16.mxu1 %v1219_v15  ;;  %v1270_v15 = vld [vmem:[%s1691_s5 + $0x1f0] ss:$8 sps:$4 sm:$0xff]  }
  0x47   :  { %877 = vmatpush1.bf16.msra.mxu1 %v1221_v16 }
  0x48   :  { %878 = vmatprep.subr.bf16.mxu1 %v1222_v17 }
  0x4b   :  { %879 = vmatpush1.bf16.msra.mxu1 %v1224_v18  ;;  %v516_v18 = vld [vmem:[%s1694_s6] sm:$0x3] }
  0x4c   :  { %889 = vmatprep.subr.bf16.mxu1 %v1227_v19  ;;  %v521_v19 = vrot.slane %v516_v18, %v1559_v22 }
  0xf4   :  { %v140_v57 = vpop.f32.mrb[0].mxu0 }
  0xf5   :  { %v141_v58 = vadd.f32 %v978_v56, %v140_v57  ;;  %v1110_v59 = vpop.f32.mrb[1].mxu0  ;;  %v1246_v57 = vld [vmem:[%s1691_s5 + $0x170] ss:$8 sps:$4 sm:$0xff]  }
  0xf6   :  { %v143_v60 = vpop.f32.mrb[2].mxu0  ;;  %v1251_v59 = vld [vmem:[%s1691_s5 + $0x184] ss:$8 sps:$4 sm:$0xff]  }
  0xf7   :  { %v146_v61 = vpack.c.bf16 %v141_v58, %v141_v58  ;;  %v1111_v62 = vpop.f32.mrb[3].mxu0 }
  0xf8   :  { %v1249_v62 = vld [vmem:[%s1691_s5 + $0x180] ss:$8 sps:$4 sm:$0xff]  }
  0xf9   :  { %1273 = vtanh.bf16 %v146_v61 }
 0x104   :  { %v1274_v1 = vpop.eup %1273 }
 0x105   :  { %395 = vmatmul.mubr.bf16.vlgmr.msra.gmra.mrb[4].mxu0 %v1274_v1 }
 0x106   :  { %404 = vmatpush1.bf16.msra.mxu0 %v1153_v63  ;;  %435 = vmatprep.mubr.bf16.mxu0 %v1277_v25  ;;  %v185_v25 = vrot.slane %v1564_v23, %v1559_v22  ;;  %v1254_v63 = vld [vmem:[%s1691_s5 + $0x194] ss:$8 sps:$4 sm:$0xff]  }
 0x107   :  { %405 = vmatprep.subr.bf16.mxu0 %v1158_v0  ;;  %v1252_v0 = vld [vmem:[%s1691_s5 + $0x190] ss:$8 sps:$4 sm:$0xff]  }
 0x10a   :  { %406 = vmatpush1.bf16.msra.mxu0 %v1156_v2  ;;  %v1255_v2 = vld [vmem:[%s1691_s5 + $0x1a0] ss:$8 sps:$4 sm:$0xff]  }
 0x10b   :  { %407 = vmatprep.subr.bf16.mxu0 %v1161_v3  ;;  %v1260_v3 = vld [vmem:[%s1691_s5 + $0x1b4] ss:$8 sps:$4 sm:$0xff]  }
 0x10e   :  { %408 = vmatpush1.bf16.msra.mxu0 %v1159_v4  ;;  %v1258_v4 = vld [vmem:[%s1691_s5 + $0x1b0] ss:$8 sps:$4 sm:$0xff]  }
 0x10f   :  { %409 = vmatprep.subr.bf16.mxu0 %v1164_v5  ;;  %v1263_v5 = vld [vmem:[%s1691_s5 + $0x1c4] ss:$8 sps:$4 sm:$0xff]  }
 0x112   :  { %410 = vmatpush1.bf16.msra.mxu0 %v1162_v6  ;;  %v1261_v6 = vld [vmem:[%s1691_s5 + $0x1c0] ss:$8 sps:$4 sm:$0xff]  }
 0x113   :  { %411 = vmatprep.subr.bf16.mxu0 %v1167_v7  ;;  %v192_v7 = vsub.s32 2, %v1556_v21 }
 0x116   :  { %412 = vmatpush1.bf16.msra.mxu0 %v1165_v8  ;;  %v1266_v8 = vld [vmem:[%s1691_s5 + $0x1d4] ss:$8 sps:$4 sm:$0xff]  }
 0x117   :  { %413 = vmatprep.subr.bf16.mxu0 %v1170_v9  ;;  %v1264_v9 = vld [vmem:[%s1691_s5 + $0x1d0] ss:$8 sps:$4 sm:$0xff]  }
 0x11a   :  { %414 = vmatpush1.bf16.msra.mxu0 %v1168_v10  ;;  %v193_v10 = vrot.slane %v1564_v23, %v192_v7  ;;  %v525_v23 = vrot.slane %v516_v18, %v1567_v24 }
 0x11b   :  { %415 = vmatprep.subr.bf16.mxu0 %v1173_v11  ;;  %v1269_v11 = vld [vmem:[%s1691_s5 + $0x1e4] ss:$8 sps:$4 sm:$0xff]  }
 0x11e   :  { %416 = vmatpush1.bf16.msra.mxu0 %v1171_v12  ;;  %v1267_v12 = vld [vmem:[%s1691_s5 + $0x1e0] ss:$8 sps:$4 sm:$0xff]  }
 0x11f   :  { %417 = vmatprep.subr.bf16.mxu0 %v1176_v13 }
 0x122   :  { %418 = vmatpush1.bf16.msra.mxu0 %v1174_v14  ;;  %v1272_v14 = vld [vmem:[%s1691_s5 + $0x1f4] ss:$8 sps:$4 sm:$0xff]  }
 0x125   :  { %436 = vmatmul.mubr.bf16.vlgmr.msra.gmra.mrb[8].mxu0 %v1274_v1  ;;  %v1257_v1 = vld [vmem:[%s1691_s5 + $0x1a4] ss:$8 sps:$4 sm:$0xff]  }
 0x1d8   :  { %v396_v27 = vpop.f32.mrb[4].mxu0 }
 0x1d9   :  { %v397_v28 = vadd.f32 %v396_v27, %v185_v25  ;;  %v398_v29 = vpop.f32.mrb[5].mxu0  ;;  %v932_v25 = vld [vmem:[%s1695_s7] sm:$0x3] }
 0x1da   :  { %v399_v30 = vadd.f32 %v398_v29, %v189_v26  ;;  %v400_v31 = vpop.f32.mrb[6].mxu0  ;;  %v937_v29 = vrot.slane %v932_v25, %v1559_v22 }
 0x1db   :  { %v444_v32 = vmax.f32 %v397_v28, 0.0  ;;  %v401_v33 = vpop.f32.mrb[7].mxu0 }
 0x1dc   :  { %v445_v34 = vmax.f32 %v399_v30, 0.0 }
 0x1dd   :  { %v448_v37 = vpack.c.bf16 %v444_v32, %v444_v32  ;;  %v941_v32 = vrot.slane %v932_v25, %v1567_v24 }
 0x1de   :  { %v449_v35 = vpack.c.bf16 %v445_v34, %v445_v34 }
 0x1e0   :  { %880 = vmatprep.mubr.bf16.mxu1 %v449_v35 }
 0x1e1   :  { %881 = vmatmul.mubr.bf16.vlgmr.msra.gmra.mrb[0].mxu1 %v448_v37 }
 0x1e2   :  { %890 = vmatpush1.bf16.msra.mxu1 %v1225_v36 }
 0x1e3   :  { %891 = vmatprep.subr.bf16.mxu1 %v1230_v38 }
 0x1e6   :  { %892 = vmatpush1.bf16.msra.mxu1 %v1228_v39  ;;  %v954_v39 = vand.u32 127, %v182_v20 }
 0x1e7   :  { %893 = vmatprep.subr.bf16.mxu1 %v1233_v40  ;;  %v950_v40 = vstv %s1696_s8 }
 0x1ea   :  { %894 = vmatpush1.bf16.msra.mxu1 %v1231_v41  ;;  %v957_v41 = vsub.s32 %v954_v39, %v1556_v21 }
 0x1eb   :  { %895 = vmatprep.subr.bf16.mxu1 %v1236_v42 }
 0x1ee   :  { %896 = vmatpush1.bf16.msra.mxu1 %v1234_v43 }
 0x1ef   :  { %897 = vmatprep.subr.bf16.mxu1 %v1239_v44 }
 0x1f2   :  { %898 = vmatpush1.bf16.msra.mxu1 %v1237_v45 }
 0x1f3   :  { %899 = vmatprep.subr.bf16.mxu1 %v1242_v46 }
 0x1f6   :  { %900 = vmatpush1.bf16.msra.mxu1 %v1240_v47 }
 0x1f7   :  { %901 = vmatprep.subr.bf16.mxu1 %v1245_v49 }
 0x1f8   :  { %v437_v53 = vpop.f32.mrb[8].mxu0 }
 0x1f9   :  { %v439_v54 = vpop.f32.mrb[9].mxu0  ;;  %v438_v13 = vadd.f32 %v437_v53, %v193_v10 }
 0x1fa   :  { %v440_v55 = vadd.f32 %v439_v54, %v197_v50  ;;  %v441_v56 = vpop.f32.mrb[10].mxu0  ;;  %902 = vmatpush1.bf16.msra.mxu1 %v1243_v51 }
 0x1fb   :  { %v442_v58 = vpop.f32.mrb[11].mxu0  ;;  %903 = vmatprep.subr.bf16.mxu1 %v1248_v52  ;;  %v446_v16 = vmax.f32 %v438_v13, 0.0 }
 0x1fc   :  { %v447_v60 = vmax.f32 %v440_v55, 0.0 }
 0x1fd   :  { %v450_v17 = vpack.c.bf16 %v446_v16, %v446_v16 }
 0x1fe   :  { %v451_v61 = vpack.c.bf16 %v447_v60, %v447_v60  ;;  %904 = vmatpush1.bf16.msra.mxu1 %v1246_v57 }
 0x1ff   :  { %905 = vmatprep.subr.bf16.mxu1 %v1251_v59 }
 0x200   :  { %921 = vmatprep.mubr.bf16.mxu1 %v451_v61 }
 0x202   :  { %906 = vmatpush1.bf16.msra.mxu1 %v1249_v62 }
 0x203   :  { %907 = vmatprep.subr.bf16.mxu1 %v1254_v63 }
 0x206   :  { %908 = vmatpush1.bf16.msra.mxu1 %v1252_v0 }
 0x207   :  { %909 = vmatprep.subr.bf16.mxu1 %v1257_v1 }
 0x20a   :  { %910 = vmatpush1.bf16.msra.mxu1 %v1255_v2 }
 0x20b   :  { %911 = vmatprep.subr.bf16.mxu1 %v1260_v3 }
 0x20e   :  { %912 = vmatpush1.bf16.msra.mxu1 %v1258_v4 }
 0x20f   :  { %913 = vmatprep.subr.bf16.mxu1 %v1263_v5 }
 0x212   :  { %914 = vmatpush1.bf16.msra.mxu1 %v1261_v6 }
 0x213   :  { %915 = vmatprep.subr.bf16.mxu1 %v1266_v8 }
 0x216   :  { %916 = vmatpush1.bf16.msra.mxu1 %v1264_v9 }
 0x217   :  { %917 = vmatprep.subr.bf16.mxu1 %v1269_v11 }
 0x21a   :  { %918 = vmatpush1.bf16.msra.mxu1 %v1267_v12 }
 0x21b   :  { %919 = vmatprep.subr.bf16.mxu1 %v1272_v14 }
 0x21e   :  { %920 = vmatpush1.bf16.msra.mxu1 %v1270_v15 }
 0x221   :  { %922 = vmatmul.mubr.bf16.vlgmr.msra.gmra.mrb[0].mxu1 %v450_v17 }
 0x2f4   :  { %v923_v26 = vpop.f32.mrb[0].mxu1 }
 0x2f5   :  { %v1112_v27 = vadd.f32 %v923_v26, %v521_v19  ;;  %v925_v28 = vpop.f32.mrb[1].mxu1 }
 0x2f6   :  { %v1113_v30 = vadd.f32 %v925_v28, %v525_v23  ;;  %v927_v31 = vpop.f32.mrb[2].mxu1 }
 0x2f7   :  { %v930_v33 = vmax.f32 %v1112_v27, 0.0  ;;  %v928_v34 = vpop.f32.mrb[3].mxu1 }
 0x2f8   :  { %v931_v35 = vmax.f32 %v1113_v30, 0.0 }
 0x2f9   :  { %v944_v36 = vmul.f32 %v937_v29, %v930_v33 }
 0x2fa   :  { %v945_v37 = vmul.f32 %v941_v32, %v931_v35 }
 0x2fc   :  { %v946_v38 = vadd.f32 %v945_v37, %v944_v36 }
 0x2fe   :  { %947 = vadd.xlane.f32.xlu0 %v946_v38 }
 0x38b   :  { %v948_v22 = vpop.xlane.xlu0 %947 }
 0x38c   :  { %v951_v42 = vadd.f32 %v950_v40, %v948_v22 }
 0x38e   :  { %v958_v43 = vrot.slane %v951_v42, %v957_v41 }
 0x390   :  { %973 = vst.msk [vmem:[%s1697_s9] sm:$0xff] %vm972_vm1, %v958_v43 }

</bundles_post_ra>
